<compile_context>
chip_gen: v7x
topology: tpu7x:2x2x1
jax: 0.10.0
libtpu: 0.0.40
codegen_flags: <defaults>
</compile_context>

<pallas_src>
import functools

import jax
import jax.numpy as jnp
from jax.experimental import pallas as pl
from jax.experimental.pallas import tpu as pltpu

# ---------------------------------------------------------------------------
# Constants (mirroring the PyTorch module)
# ---------------------------------------------------------------------------
GAMMA = 1.76 * 0.001           # Bernoulli keep-probability for non-tail classes
NEG_FILL = -10000000.0         # replace_masked_values fill
STEP_EPOCH = 20
BETAS = (0, 1)                 # 'drw' scheduler

_LANE = 128                    # TPU lane width (partial-sum output is lane dense)
_MAX_TILE_ROWS = 4096          # upper cap on rows per grid step
_TEMP_WORDS_PER_ELEM = 6       # ~full-tile f32/i32 temps Mosaic keeps live
_VMEM_FALLBACK = 128 * 1024 * 1024

# Deterministic counter-based Bernoulli hash constants (pure uint32 jnp ops).
_ROW_MULT = 0x9E3779B1
_COL_MULT = 0x85EBCA77
_MIX_MULT = 0x7FEB352D
_GAMMA_U32 = int(round(GAMMA * (1 << 32)))   # P(hash_u32 < thresh) == GAMMA


def get_num_class_list(split):
    the_split = split['split']
    num_classes = split['num_classes']
    if the_split == 'xset_train':
        skeleton_max, imb_factor = 400, 0.01
    elif the_split == 'train':
        skeleton_max, imb_factor = 100, 0.1
    else:
        skeleton_max, imb_factor = 600, 0.01
    return [int(skeleton_max * imb_factor ** (c / (num_classes - 1.0)))
            for c in range(num_classes)]


def _cdiv(a, b):
    return -(-a // b)


def _round_up(x, m):
    return _cdiv(x, m) * m


def _vmem_capacity_bytes():
    """Per-core VMEM capacity; falls back to 128 MiB off-TPU / old jax."""
    try:
        cap = getattr(pltpu.get_tpu_info(), "vmem_capacity_bytes", None)
        if cap:
            return int(cap)
    except Exception:
        pass
    return _VMEM_FALLBACK


def _choose_tiling(n, c, itemsize):
    """Pick the row-tile size from the *total* VMEM footprint, not just input bytes."""
    itemsize = int(itemsize)
    # Sub-32-bit dtypes pack rows along sublanes (bf16: 16, int8: 32 per vreg).
    row_align = 8 * max(1, 4 // itemsize)

    vmem_cap = _vmem_capacity_bytes()
    # ~38 MiB limit on v7x (64 MiB/TC), 64 MiB on v5e/v6e (128 MiB).
    vmem_limit = min(int(vmem_cap * 0.6), 64 * 1024 * 1024)
    usable = int(vmem_limit * 0.65)

    # Per row: 2x double-buffered native-dtype input tile + full-tile f32/i32
    # temporaries (f32 cast, masks, hash bits, exp) around the reductions.
    per_row = c * (2 * itemsize + 4 * _TEMP_WORDS_PER_ELEM)
    rows = (usable // max(per_row, 1)) // row_align * row_align
    rows = max(row_align, min(rows, _MAX_TILE_ROWS))

    n_ceil = _round_up(n, row_align)
    if rows >= n_ceil:
        if n_ceil >= 2 * row_align:
            # Whole batch fits in one tile: split in two so both TensorCores of
            # a v7x megacore get work (grid axis is "parallel").
            rows = _round_up(_cdiv(n_ceil, 2), row_align)
        else:
            rows = n_ceil
    n_tiles = _cdiv(n, rows)
    return rows, n_tiles, vmem_limit


# ---------------------------------------------------------------------------
# Deterministic Bernoulli(GAMMA) draw -- identical in-kernel and on host.
# ---------------------------------------------------------------------------

def _bernoulli_over(rows_u32, cols_u32, seed_u32):
    """Keep-mask with P(True) == GAMMA.  Pure uint32 ops -> lowers everywhere."""
    key = rows_u32 * jnp.uint32(_ROW_MULT) + seed_u32           # (rows, 1): cheap
    key = key ^ (cols_u32 * jnp.uint32(_COL_MULT))              # broadcast to tile
    h = key ^ (key >> jnp.uint32(16))
    h = h * jnp.uint32(_MIX_MULT)
    h = h ^ (h >> jnp.uint32(15))
    return h < jnp.uint32(_GAMMA_U32)                           # unsigned compare


# ---------------------------------------------------------------------------
# Kernels
# ---------------------------------------------------------------------------

def _plain_ce_kernel(logits_ref, target_ref, out_ref, *, n_valid):
    x = logits_ref[...].astype(jnp.float32)                     # (tile_n, C)
    tile_n, c = x.shape
    col = jax.lax.broadcasted_iota(jnp.int32, (1, c), 1)        # (1, C)
    is_gt = col == target_ref[...]                              # (tile_n, C) bool

    m = jnp.max(x, axis=-1, keepdims=True)
    lse = m + jnp.log(jnp.sum(jnp.exp(x - m), axis=-1, keepdims=True))
    gt = jnp.sum(jnp.where(is_gt, x, 0.0), axis=-1, keepdims=True)

    row = (jax.lax.broadcasted_iota(jnp.int32, (tile_n, 1), 0)
           + pl.program_id(0) * tile_n)
    s = jnp.sum(jnp.where(row < n_valid, lse - gt, 0.0))        # ragged tail -> 0
    out_ref[...] = s + jnp.zeros(out_ref.shape, out_ref.dtype)


def _eql_masked_kernel(seed_ref, tail_ref, logits_ref, target_ref, out_ref, *,
                       n_valid):
    x = logits_ref[...].astype(jnp.float32)                     # (tile_n, C)
    tile_n, c = x.shape
    col = jax.lax.broadcasted_iota(jnp.int32, (1, c), 1)        # (1, C)
    is_gt = col == target_ref[...]                              # one_hot(target)

    row = (jax.lax.broadcasted_iota(jnp.int32, (tile_n, 1), 0)
           + pl.program_id(0) * tile_n)                         # absolute row idx

    # On-chip Bernoulli(GAMMA) draw: deterministic hash of (row, col, seed) --
    # no (N, C) rand tensor in HBM, reproducible, order-independent per tile.
    over = _bernoulli_over(row.astype(jnp.uint32), col.astype(jnp.uint32),
                           seed_ref[0].astype(jnp.uint32))

    w = (tail_ref[...] != 0) | over | is_gt                     # boolean keep-mask
    xm = jnp.where(w, x, jnp.float32(NEG_FILL))                 # replace_masked_values

    m = jnp.max(xm, axis=-1, keepdims=True)
    lse = m + jnp.log(jnp.sum(jnp.exp(xm - m), axis=-1, keepdims=True))
    gt = jnp.sum(jnp.where(is_gt, xm, 0.0), axis=-1, keepdims=True)

    s = jnp.sum(jnp.where(row < n_valid, lse - gt, 0.0))        # ragged tail -> 0
    out_ref[...] = s + jnp.zeros(out_ref.shape, out_ref.dtype)


# ---------------------------------------------------------------------------
# pallas_call wrappers
# ---------------------------------------------------------------------------

def _plain_call(logits, target2d, tile_n, n_tiles, vmem_limit):
    n, c = logits.shape
    itemsize = jnp.dtype(logits.dtype).itemsize
    kernel = functools.partial(_plain_ce_kernel, n_valid=n)
    cost = pl.CostEstimate(
        flops=8 * n * c, transcendentals=n * c,
        bytes_accessed=int(n * c * itemsize + n * 4 + n_tiles * _LANE * 4))
    partials = pl.pallas_call(
        kernel,
        out_shape=jax.ShapeDtypeStruct((1, n_tiles * _LANE), jnp.float32),
        grid_spec=pltpu.PrefetchScalarGridSpec(
            num_scalar_prefetch=0,
            grid=(n_tiles,),
            in_specs=[pl.BlockSpec((tile_n, c), lambda i: (i, 0)),
                      pl.BlockSpec((tile_n, 1), lambda i: (i, 0))],
            out_specs=pl.BlockSpec((1, _LANE), lambda i: (0, i))),
        compiler_params=pltpu.CompilerParams(
            dimension_semantics=("parallel",),
            vmem_limit_bytes=vmem_limit),
        cost_estimate=cost,
    )(logits, target2d)
    return jnp.sum(partials.reshape(n_tiles, _LANE)[:, 0]) / float(n)


def _masked_call(logits, target2d, tail_p, seed_arr, tile_n, n_tiles, vmem_limit):
    n, c = logits.shape
    itemsize = jnp.dtype(logits.dtype).itemsize
    kernel = functools.partial(_eql_masked_kernel, n_valid=n)
    cost = pl.CostEstimate(
        flops=16 * n * c, transcendentals=n * c,
        bytes_accessed=int(n * c * itemsize + n * 4 + c * 4 + n_tiles * _LANE * 4))
    partials = pl.pallas_call(
        kernel,
        out_shape=jax.ShapeDtypeStruct((1, n_tiles * _LANE), jnp.float32),
        grid_spec=pltpu.PrefetchScalarGridSpec(
            num_scalar_prefetch=1,
            grid=(n_tiles,),
            in_specs=[pl.BlockSpec((1, c), lambda i, s: (0, 0)),        # tail flags
                      pl.BlockSpec((tile_n, c), lambda i, s: (i, 0)),   # logits
                      pl.BlockSpec((tile_n, 1), lambda i, s: (i, 0))],  # targets
            out_specs=pl.BlockSpec((1, _LANE), lambda i, s: (0, i))),
        compiler_params=pltpu.CompilerParams(
            dimension_semantics=("parallel",),
            vmem_limit_bytes=vmem_limit),
        cost_estimate=cost,
    )(seed_arr, tail_p, logits, target2d)
    return jnp.sum(partials.reshape(n_tiles, _LANE)[:, 0]) / float(n)


# ---------------------------------------------------------------------------
# Public wrapper mirroring TwostageEQL.forward
# ---------------------------------------------------------------------------

def twostage_eql_loss(logits, target, epoch, split, seed=0):
    n_i, n_c = logits.shape
    idx = (int(epoch['epoch']) + 1) // STEP_EPOCH
    # TODO(synk): the torch module would IndexError for epoch >= 39; we clamp
    # the schedule index to the final ('drw') stage instead.
    idx = min(idx, len(BETAS) - 1)
    beta = BETAS[idx]

    tile_n, n_tiles, vmem_limit = _choose_tiling(
        n_i, n_c, jnp.dtype(logits.dtype).itemsize)
    target2d = target.reshape(n_i, 1).astype(jnp.int32)

    if beta == 0:
        return _plain_call(logits, target2d, tile_n, n_tiles, vmem_limit)

    num_class_list = get_num_class_list(split)
    cls_tail = int(len(num_class_list) / 3) * 2
    max_tail_num = num_class_list[cls_tail]
    tail_flag = [1 if num_class_list[i] < max_tail_num else 0
                 for i in range(len(num_class_list))]
    tail_p = jnp.asarray(tail_flag, dtype=jnp.int32).reshape(1, n_c)
    seed_arr = jnp.asarray([int(seed) & 0x7FFFFFFF], dtype=jnp.int32)
    return _masked_call(logits, target2d, tail_p, seed_arr, tile_n, n_tiles,
                        vmem_limit)


# ---------------------------------------------------------------------------
# Pure-JAX reference (shares the deterministic Bernoulli stream)
# ---------------------------------------------------------------------------

def _ref_over(n, c, seed):
    rows = jnp.arange(n, dtype=jnp.uint32).reshape(n, 1)
    cols = jnp.arange(c, dtype=jnp.uint32).reshape(1, c)
    return _bernoulli_over(rows, cols, jnp.uint32(int(seed) & 0x7FFFFFFF))


def _ref_loss(logits, target, tail_w, over, apply_mask):
    n, c = logits.shape
    x = logits.astype(jnp.float32)
    is_gt = jax.nn.one_hot(target, c, dtype=jnp.float32)
    if apply_mask:
        w = ((tail_w + over.astype(jnp.float32) + is_gt) > 0).astype(jnp.float32)
        x = x * w + NEG_FILL * (1.0 - w)
    lse = jax.scipy.special.logsumexp(x, axis=-1)
    return jnp.mean(lse - jnp.sum(x * is_gt, axis=-1))


if __name__ == "__main__":
    key = jax.random.PRNGKey(0)
    k1, k2, k3, k4 = jax.random.split(key, 4)

    N, C = 8, 60                        # small batch, NTU-like class count
    logits = jax.random.normal(k1, (N, C), dtype=jnp.float32)
    target = jax.random.randint(k2, (N,), 0, C, dtype=jnp.int32)
    split = {'split': 'train', 'num_classes': C}
    SEED = 1234

    # Production paths (beta==0 plain CE, beta==1 masked EQL, clamped schedule).
    loss_plain = twostage_eql_loss(logits, target, {'epoch': 0}, split, seed=SEED)
    loss_masked = twostage_eql_loss(logits, target, {'epoch': 25}, split, seed=SEED)
    loss_late = twostage_eql_loss(logits, target, {'epoch': 45}, split, seed=SEED)
    jax.block_until_ready((loss_plain, loss_masked, loss_late))

    # Reference uses the exact same deterministic Bernoulli mask.
    num_class_list = get_num_class_list(split)
    max_tail_num = num_class_list[int(len(num_class_list) / 3) * 2]
    tail_w = jnp.asarray([1.0 if v < max_tail_num else 0.0 for v in num_class_list],
                         jnp.float32).reshape(1, C)
    over = _ref_over(N, C, SEED)
    ref_plain = _ref_loss(logits, target, tail_w, over, False)
    ref_masked = _ref_loss(logits, target, tail_w, over, True)

    assert jnp.allclose(loss_plain, ref_plain, atol=1e-4, rtol=1e-4), \
        (loss_plain, ref_plain)
    assert jnp.allclose(loss_masked, ref_masked, atol=1e-4, rtol=1e-4), \
        (loss_masked, ref_masked)
    # Same kernel / seed / inputs -> the clamped-epoch path must agree exactly.
    assert jnp.allclose(loss_masked, loss_late), (loss_masked, loss_late)
    # Masking only removes probability mass from non-target classes.
    assert float(loss_masked) >= -1e-5
    assert float(loss_masked) <= float(loss_plain) + 1e-4

    # Ragged batch: exercises in-kernel row masking (no host-side padding copy).
    N2 = 13
    logits2 = jax.random.normal(k3, (N2, C), dtype=jnp.float32)
    target2 = jax.random.randint(k4, (N2,), 0, C, dtype=jnp.int32)
    lp2 = twostage_eql_loss(logits2, target2, {'epoch': 0}, split, seed=SEED)
    lm2 = twostage_eql_loss(logits2, target2, {'epoch': 25}, split, seed=SEED)
    over2 = _ref_over(N2, C, SEED)
    assert jnp.allclose(lp2, _ref_loss(logits2, target2, tail_w, over2, False),
                        atol=1e-4, rtol=1e-4)
    assert jnp.allclose(lm2, _ref_loss(logits2, target2, tail_w, over2, True),
                        atol=1e-4, rtol=1e-4)

    # bf16 logits stay bf16 in HBM; the f32 cast happens in-kernel.
    loss_bf16 = twostage_eql_loss(logits.astype(jnp.bfloat16), target,
                                  {'epoch': 25}, split, seed=SEED)
    ref_bf16 = _ref_loss(logits.astype(jnp.bfloat16).astype(jnp.float32),
                         target, tail_w, over, True)
    jax.block_until_ready(loss_bf16)
    assert bool(jnp.isfinite(loss_bf16))
    assert jnp.allclose(loss_bf16, ref_bf16, atol=1e-3, rtol=1e-3), \
        (loss_bf16, ref_bf16)

    print("KERNEL_OK")
</pallas_src>

<mosaic_0001>
module attributes {stable_mosaic.version = 11 : i64} {
  func.func @_plain_ce_kernel(%arg0: i32, %arg1: memref<8x60xf32, #tpu.memory_space<vmem>>, %arg2: memref<8x1xi32, #tpu.memory_space<vmem>>, %arg3: memref<1x128xf32, #tpu.memory_space<vmem>>) attributes {dimension_semantics = [#tpu.dimension_semantics<parallel>], iteration_bounds = array<i64: 1>, scalar_prefetch = 0 : i64, scratch_operands = 0 : i64, tpu.core_type = #tpu.core_type<tc>, window_params = [{transform_indices = @transform_0, window_bounds = array<i64: 8, 60>}, {transform_indices = @transform_1, window_bounds = array<i64: 8, 1>}, {transform_indices = @transform_2, window_bounds = array<i64: 1, 128>}]} {
    %c0 = arith.constant 0 : index
    %c0_0 = arith.constant 0 : index
    %0 = vector.load %arg1[%c0, %c0_0] : memref<8x60xf32, #tpu.memory_space<vmem>>, vector<8x60xf32>
    %1 = tpu.iota {dimensions = array<i32: 1>} : vector<1x60xi32>
    %c0_1 = arith.constant 0 : index
    %c0_2 = arith.constant 0 : index
    %2 = vector.load %arg2[%c0_1, %c0_2] : memref<8x1xi32, #tpu.memory_space<vmem>>, vector<8x1xi32>
    %3 = vector.broadcast %1 : vector<1x60xi32> to vector<8x60xi32>
    %4 = vector.broadcast %2 : vector<8x1xi32> to vector<8x60xi32>
    %5 = arith.cmpi eq, %3, %4 : vector<8x60xi32>
    %cst = arith.constant dense<0xFF800000> : vector<8xf32>
    %6 = vector.multi_reduction <maximumf>, %0, %cst [1] : vector<8x60xf32> to vector<8xf32>
    %7 = vector.shape_cast %6 : vector<8xf32> to vector<8x1xf32>
    %8 = vector.broadcast %7 : vector<8x1xf32> to vector<8x60xf32>
    %9 = arith.subf %0, %8 : vector<8x60xf32>
    %10 = math.exp %9 : vector<8x60xf32>
    %cst_3 = arith.constant dense<0.000000e+00> : vector<8xf32>
    %11 = vector.multi_reduction <add>, %10, %cst_3 [1] : vector<8x60xf32> to vector<8xf32>
    %12 = vector.shape_cast %11 : vector<8xf32> to vector<8x1xf32>
    %13 = math.log %12 : vector<8x1xf32>
    %14 = arith.addf %7, %13 : vector<8x1xf32>
    %cst_4 = arith.constant 0.000000e+00 : f32
    %15 = vector.broadcast %cst_4 : f32 to vector<8x60xf32>
    %16 = arith.select %5, %0, %15 : vector<8x60xi1>, vector<8x60xf32>
    %cst_5 = arith.constant dense<0.000000e+00> : vector<8xf32>
    %17 = vector.multi_reduction <add>, %16, %cst_5 [1] : vector<8x60xf32> to vector<8xf32>
    %18 = vector.shape_cast %17 : vector<8xf32> to vector<8x1xf32>
    %19 = tpu.iota {dimensions = array<i32: 0>} : vector<8x1xi32>
    %c8_i32 = arith.constant 8 : i32
    %20 = arith.muli %arg0, %c8_i32 : i32
    %21 = vector.broadcast %20 : i32 to vector<8x1xi32>
    %22 = arith.addi %19, %21 : vector<8x1xi32>
    %c8_i32_6 = arith.constant 8 : i32
    %23 = vector.broadcast %c8_i32_6 : i32 to vector<8x1xi32>
    %24 = arith.cmpi slt, %22, %23 : vector<8x1xi32>
    %25 = arith.subf %14, %18 : vector<8x1xf32>
    %cst_7 = arith.constant 0.000000e+00 : f32
    %26 = vector.broadcast %cst_7 : f32 to vector<8x1xf32>
    %27 = arith.select %24, %25, %26 : vector<8x1xi1>, vector<8x1xf32>
    %28 = vector.shape_cast %27 : vector<8x1xf32> to vector<1x8x1xf32>
    %cst_8 = arith.constant dense<0.000000e+00> : vector<1xf32>
    %29 = vector.multi_reduction <add>, %28, %cst_8 [1, 2] : vector<1x8x1xf32> to vector<1xf32>
    %30 = vector.shape_cast %29 : vector<1xf32> to vector<1x1x1xf32>
    %31 = vector.extract %30[0, 0, 0] : f32 from vector<1x1x1xf32>
    %cst_9 = arith.constant 0.000000e+00 : f32
    %32 = vector.broadcast %cst_9 : f32 to vector<1x128xf32>
    %33 = vector.broadcast %31 : f32 to vector<1x128xf32>
    %34 = arith.addf %33, %32 : vector<1x128xf32>
    %c0_10 = arith.constant 0 : index
    %c0_11 = arith.constant 0 : index
    %35 = vector.load %arg3[%c0_10, %c0_11] : memref<1x128xf32, #tpu.memory_space<vmem>>, vector<1x128xf32>
    tpu.vector_store %arg3[%c0_10, %c0_11], %34 {strides = array<i32>} : memref<1x128xf32, #tpu.memory_space<vmem>>, vector<1x128xf32>,
    return
  }
  func.func @transform_0(%arg0: i32) -> (i32, i32) {
    %c0_i32 = arith.constant 0 : i32
    %c0_i32_0 = arith.constant 0 : i32
    return %arg0, %c0_i32 : i32, i32
  }
  func.func @transform_1(%arg0: i32) -> (i32, i32) {
    %c0_i32 = arith.constant 0 : i32
    %c0_i32_0 = arith.constant 0 : i32
    return %arg0, %c0_i32 : i32, i32
  }
  func.func @transform_2(%arg0: i32) -> (i32, i32) {
    %c0_i32 = arith.constant 0 : i32
    %c0_i32_0 = arith.constant 0 : i32
    return %c0_i32, %arg0 : i32, i32
  }
}

</mosaic_0001>

<bundles_post_ra>
// kernel: tpu_custom_call.1
= control target key start
LH: loop header
LB: loop body
LE: loop exit
PB: predicated region body
PF: predicated region fallthrough
CT: control target
= control target key end

     0   :  { %7 = vsyncpa [#allocation3], 0  ;;  %s240_s0 = inlined_call_operand.hbm [shape: f32[8,60], index: 0, kind: input, shape index: {}]   ;;  %s241_s1 = inlined_call_operand.hbm [shape: s32[8,1], index: 1, kind: input, shape index: {}]   ;;  %s242_s2 = inlined_call_operand.hbm [shape: f32[1,128], index: 2, kind: output, shape index: {}]  }
   0x1   :  { %8 = vsyncpa [#allocation6], 0 }
   0x2   :  { %9 = vsyncpa [#allocation4], 0  ;;  %s182_s9 = smov [#allocation2]   ;;  %s183_s11 = smov [#allocation5]  }
   0x3   :  { %s16_s10 = sshll.u32 %s182_s9, 4  ;;  %s26_s12 = sshll.u32 %s183_s11, 4  ;;  %s17_s10 = int_to_ptr.vmem [resolvable:$true] %s16_s10  ;;  %s27_s12 = int_to_ptr.vmem [resolvable:$true] %s26_s12 }
   0x4   :  { %s110_s15 = scalar_lea.hbm %s240_s0, 128 }
   0x5   :  { %p111_p0 = scmp.ne.s32.totalorder %s240_s0, %s110_s15  ;;  %p114_p1 = scmp.lt.u32.totalorder %s110_s15, %s240_s0 }
   0x7   :  { %p116_p2 = pnand %p114_p1, %p111_p0 }
   0x9   :  { %119 = shalt.err (!%p116_p2)
}
   0xa   :  { %s120_s20 = scalar_lea.vmem %s17_s10, 128  ;;  %p125_p4 = scmp.lt.s32.totalorder %s17_s10, %s17_s10 }
   0xb   :  { %p121_p3 = scmp.ne.s32.totalorder %s17_s10, %s120_s20  ;;  %p126_p5 = scmp.lt.s32.totalorder %s120_s20, %s120_s20 }
   0xd   :  { %p127_p6 = por %p126_p5, %p125_p4 }
   0xf   :  { %p128_p7 = pnand %p127_p6, %p121_p3 }
  0x11   :  { %131 = shalt.err (!%p128_p7)
}
  0x12   :  { %19 = dma.hbm_to_vmem [thread:$0]  %s240_s0, 128, %s17_s10, [#allocation3]  }
  0x13   :  { %s132_s25 = scalar_lea.hbm %s241_s1, 128 }
  0x14   :  { %p133_p8 = scmp.ne.s32.totalorder %s241_s1, %s132_s25  ;;  %p136_p9 = scmp.lt.u32.totalorder %s132_s25, %s241_s1 }
  0x16   :  { %p138_p10 = pnand %p136_p9, %p133_p8 }
  0x18   :  { %141 = shalt.err (!%p138_p10)
}
  0x19   :  { %s142_s30 = scalar_lea.vmem %s27_s12, 128  ;;  %p147_p12 = scmp.lt.s32.totalorder %s27_s12, %s27_s12 }
  0x1a   :  { %p143_p11 = scmp.ne.s32.totalorder %s27_s12, %s142_s30  ;;  %p148_p13 = scmp.lt.s32.totalorder %s142_s30, %s142_s30 }
  0x1c   :  { %p149_p0 = por %p148_p13, %p147_p12 }
  0x1e   :  { %p150_p1 = pnand %p149_p0, %p143_p11 }
  0x20   :  { %153 = shalt.err (!%p150_p1)
}
  0x21   :  { %29 = dma.hbm_to_vmem [thread:$0]  %s241_s1, 128, %s27_s12, [#allocation6]  }
  0x22   :  { %176 = dma.done.wait [#allocation3], 128  }
  0x23   :  { %177 = vsyncadd [#allocation3], 4294967168 }
  0x24   :  { %178 = dma.done.wait [#allocation6], 128  }
  0x25   :  { %179 = vsyncadd [#allocation6], 4294967168  ;;  %v184_v0 = vmov 0   ;;  %vm44_vm0 = vcmask 490496   ;;  %v36_v1 = vld [vmem:[#allocation2] sm:$0xff]  ;;  %v39_v3 = vld [vmem:[#allocation5] sm:$0xff]  ;;  %v37_v7 = vlaneseq }
  0x26   :  { %105 = vset.pattern.permute.xlu0 %v184_v0  ;;  %v45_v2 = vsel %vm44_vm0, %v36_v1, -inf  ;;  %vm69_vm2 = vcmask 7168   ;;  %s185_s1 = smov [#allocation7]  }
  0x27   :  { %46 = vmax.xlane.f32.xlu0 %v45_v2  ;;  %v38_v8 = vand.u32 127, %v37_v7  ;;  %s89_s4 = sshll.u32 %s185_s1, 4  ;;  %s90_s4 = int_to_ptr.vmem [resolvable:$true] %s89_s4 }
  0x28   :  { %s154_s6 = scalar_lea.vmem %s90_s4, 16  ;;  %s158_s7 = scalar_lea.vmem %s90_s4, 32 }
  0x29   :  { %p155_p2 = scmp.ne.s32.totalorder %s90_s4, %s154_s6  ;;  %p159_p3 = scmp.lt.s32.totalorder %s90_s4, %s90_s4 }
  0x2a   :  { %p160_p4 = scmp.lt.s32.totalorder %s158_s7, %s154_s6 }
  0x2c   :  { %p161_p5 = por %p160_p4, %p159_p3 }
  0x2e   :  { %p162_p6 = pnand %p161_p5, %p155_p2 }
  0x3d   :  { %41 = vperm.xlu0 %105, %v39_v3  }
  0xb4   :  { %v47_v4 = vpop.xlane.xlu0 %46 }
  0xb5   :  { %v48_v5 = vsub.f32 %v36_v1, %v47_v4 }
  0xb7   :  { %v49_v6 = vmul.f32 1.442695, %v48_v5 }
  0xb9   :  { %106 = vpow2.f32 %v49_v6 }
  0xbc   :  { %v42_v9 = vpop.permute.xlu0 %41 }
  0xbd   :  { %vm43_vm1 = vcmp.eq.s32.totalorder %v38_v8, %v42_v9 }
  0xbe   :  { %v57_v11 = vsel %vm43_vm1, %v36_v1, 0.0 }
  0xbf   :  { %v58_v13 = vsel %vm44_vm0, %v57_v11, 0.0 }
  0xc3   :  { %v107_v10 = vpop.eup %106 }
  0xc4   :  { %v51_v12 = vsel %vm44_vm0, %v107_v10, 0.0 }
  0xc5   :  { %52 = vadd.xlane.f32.xlu1 %v51_v12 }
  0xc9   :  { %59 = vadd.xlane.f32.xlu1 %v58_v13 }
 0x152   :  { %v53_v14 = vpop.xlane.xlu1 %52 }
 0x153   :  { %108 = vlog2.f32 %v53_v14 }
 0x156   :  { %v60_v17 = vpop.xlane.xlu1 %59 }
 0x15d   :  { %v109_v15 = vpop.eup %108 }
 0x15e   :  { %v55_v16 = vmul.f32 0.6931472, %v109_v15 }
 0x160   :  { %v56_v18 = vadd.f32 %v55_v16, %v47_v4 }
 0x162   :  { %v67_v19 = vsub.f32 %v56_v18, %v60_v17 }
 0x164   :  { %v70_v20 = vsel %vm69_vm2, %v67_v19, 0.0 }
 0x165   :  { %71 = vadd.xlane.f32.xlu1 %v70_v20 }
 0x1f2   :  { %v72_v21 = vpop.xlane.xlu1 %71 }
 0x1f3   :  { %v73_v22 = vrot.slane %v72_v21, 4 }
 0x1f5   :  { %v74_v23 = vadd.f32 %v73_v22, %v72_v21 }
 0x1f7   :  { %v75_v24 = vrot.slane %v74_v23, 2 }
 0x1f9   :  { %v76_v25 = vadd.f32 %v75_v24, %v74_v23 }
 0x1fb   :  { %v77_v26 = vrot.slane %v76_v25, 1 }
 0x1fd   :  { %v78_v27 = vadd.f32 %v77_v26, %v76_v25 }
 0x1ff   :  { %99 = vpush %v78_v27 }
 0x230   :  { %s100_s5 = spop %99 }
 0x231   :  { %v80_v28 = vstv %s100_s5 }
 0x232   :  { %82 = vst [vmem:[#allocation7] sm:$0x1] %v80_v28 }
 0x233   :  { %165 = shalt.err (!%p162_p6)
}
 0x234   :  { %s166_s10 = scalar_lea.hbm %s242_s2, 16 }
 0x235   :  { %p167_p7 = scmp.ne.s32.totalorder %s242_s2, %s166_s10  ;;  %p170_p8 = scmp.lt.u32.totalorder %s166_s10, %s242_s2 }
 0x237   :  { %p172_p9 = pnand %p170_p8, %p167_p7 }
 0x239   :  { %175 = shalt.err (!%p172_p9)
}
 0x23a   :  { %92 = dma.vmem_to_hbm [thread:$0]  %s90_s4, 16, %s242_s2, [#allocation4]  }
 0x23b   :  { %180 = dma.done.wait [#allocation4], 16  }
 0x23c   :  { %181 = vsyncadd [#allocation4], 4294967280 }
 0x23d   :  { %96 = vsyncpa [#allocation3], 1 }
 0x23e   :  { %97 = vsyncpa [#allocation6], 1 }
 0x23f   :  { %98 = vsyncpa [#allocation4], 1 }

</bundles_post_ra>
